<compile_context>
chip_gen: v7x
topology: tpu7x:2x2x1
jax: 0.10.0
libtpu: 0.0.40
codegen_flags: <defaults>
</compile_context>

<pallas_src>
import jax
import jax.numpy as jnp
from jax.experimental import pallas as pl
from jax.experimental.pallas import tpu as pltpu


def _copy_kernel(x_ref, o_ref):
    # Identity copy of one lane-dense (tile_rows, cols) tile.
    o_ref[...] = x_ref[...]


def _vmem_capacity_bytes():
    """Physical per-core VMEM; conservative v7x default if the query fails."""
    try:
        info = pltpu.get_tpu_info()
        v = getattr(info, "vmem_capacity_bytes", None)
        if v:
            return int(v)
    except Exception:
        pass
    return 64 * 1024 * 1024  # v7x per-TC VMEM (smallest of the target chips)


_MIN_SPLIT_BYTES = 1 * 1024 * 1024  # above this, force multiple grid steps
_MIN_TILES = 4                      # >= 2 tiles per TensorCore on v7x


def _plan_copy(shape, dtype):
    """Pick a lane-dense 2D slab and row tiling for the identity copy."""
    B, C, H, W = shape
    total = B * C * H * W
    itemsize = jnp.dtype(dtype).itemsize
    total_bytes = total * itemsize

    # Lane-dense layout: last dim a multiple of 128 whenever possible so every
    # store is a full (unmasked) vst.
    cols = None
    for cand in (512, 256, 128):
        if total % cand == 0:
            cols = cand
            break
    if cols is None:
        # Rare (total not a multiple of 128): natural (B*C*H, W) factorization.
        # Last dim equals the full array dim -> tiling constraint satisfied;
        # rows are still tiled below, so per-tile VMEM stays bounded.
        cols = W
    rows = total // cols

    vmem = _vmem_capacity_bytes()
    tile_cap_bytes = vmem // 8  # ~8 MiB on v7x, ~16 MiB on v5e/v6e
    row_bytes = cols * itemsize
    max_rows_by_cap = max(1, tile_cap_bytes // row_bytes)

    # Force at least _MIN_TILES grid steps for non-tiny tensors (megacore
    # sharding on v7x + in/out DMA overlap everywhere).
    min_tiles = _MIN_TILES if total_bytes > _MIN_SPLIT_BYTES else 1
    max_rows_by_split = -(-rows // min_tiles)  # ceil(rows / min_tiles)
    target_rows = min(max_rows_by_cap, max_rows_by_split)

    if target_rows >= rows:
        tile_rows = rows  # tiny tensor: one full-slab block (full-dim block)
    else:
        tile_rows = (target_rows // 32) * 32   # full packed sublane groups
        if tile_rows == 0:
            tile_rows = (target_rows // 8) * 8
        if tile_rows == 0:
            tile_rows = max(1, target_rows)    # pathological very-wide rows

    grid_n = pl.cdiv(rows, tile_rows)
    vmem_limit = min(vmem * 3 // 4, 96 * 1024 * 1024)
    return rows, cols, tile_rows, grid_n, vmem_limit, total_bytes


def pixel_shuffle(x, ry=2, rx=2):
    B, C, H, W = x.shape
    assert H % ry == 0 and W % rx == 0, "H/W must be divisible by ry/rx"

    rows, cols, tile_rows, grid_n, vmem_limit, total_bytes = _plan_copy(
        x.shape, x.dtype)
    flat = x.reshape(rows, cols)

    y = pl.pallas_call(
        _copy_kernel,
        out_shape=jax.ShapeDtypeStruct((rows, cols), x.dtype),
        grid_spec=pltpu.PrefetchScalarGridSpec(
            num_scalar_prefetch=0,
            grid=(grid_n,),
            in_specs=[pl.BlockSpec((tile_rows, cols), lambda i: (i, 0))],
            out_specs=pl.BlockSpec((tile_rows, cols), lambda i: (i, 0)),
        ),
        compiler_params=pltpu.CompilerParams(
            dimension_semantics=("parallel",),  # shards across TCs on v7x
            vmem_limit_bytes=vmem_limit,
        ),
        cost_estimate=pl.CostEstimate(
            flops=0, transcendentals=0,
            bytes_accessed=2 * total_bytes),
    )(flat)

    # Metadata-only reshape: exactly what the PyTorch forward returns (its
    # permute / second reshape are unassigned no-ops, so no data reordering).
    return y.reshape(B, C, H // ry, ry, W // rx, rx)


if __name__ == "__main__":
    key = jax.random.PRNGKey(0)
    B, C, H, W = 2, 4, 16, 16
    ry, rx = 2, 2
    x = jax.random.normal(key, (B, C, H, W), dtype=jnp.float32)

    out = pixel_shuffle(x, ry=ry, rx=rx)
    out = jax.block_until_ready(out)

    # Reference: identical data, reshaped row-major (matches the PyTorch
    # module, whose permute / second-reshape results are discarded).
    ref = x.reshape(B, C, H // ry, ry, W // rx, rx)
    assert out.shape == (B, C, H // ry, ry, W // rx, rx), out.shape
    assert out.dtype == x.dtype
    assert bool(jnp.all(out == ref))

    print("KERNEL_OK")
</pallas_src>

<mosaic_0001>
module attributes {stable_mosaic.version = 11 : i64} {
  func.func @_copy_kernel(%arg0: i32, %arg1: memref<4x512xf32, #tpu.memory_space<vmem>>, %arg2: memref<4x512xf32, #tpu.memory_space<vmem>>) attributes {dimension_semantics = [#tpu.dimension_semantics<parallel>], iteration_bounds = array<i64: 1>, scalar_prefetch = 0 : i64, scratch_operands = 0 : i64, tpu.core_type = #tpu.core_type<tc>, window_params = [{transform_indices = @transform_0, window_bounds = array<i64: 4, 512>}, {transform_indices = @transform_1, window_bounds = array<i64: 4, 512>}]} {
    %c0 = arith.constant 0 : index
    %c0_0 = arith.constant 0 : index
    %0 = vector.load %arg1[%c0, %c0_0] : memref<4x512xf32, #tpu.memory_space<vmem>>, vector<4x512xf32>
    %c0_1 = arith.constant 0 : index
    %c0_2 = arith.constant 0 : index
    %1 = vector.load %arg2[%c0_1, %c0_2] : memref<4x512xf32, #tpu.memory_space<vmem>>, vector<4x512xf32>
    tpu.vector_store %arg2[%c0_1, %c0_2], %0 {strides = array<i32>} : memref<4x512xf32, #tpu.memory_space<vmem>>, vector<4x512xf32>,
    return
  }
  func.func @transform_0(%arg0: i32) -> (i32, i32) {
    %c0_i32 = arith.constant 0 : i32
    %c0_i32_0 = arith.constant 0 : i32
    return %arg0, %c0_i32 : i32, i32
  }
  func.func @transform_1(%arg0: i32) -> (i32, i32) {
    %c0_i32 = arith.constant 0 : i32
    %c0_i32_0 = arith.constant 0 : i32
    return %arg0, %c0_i32 : i32, i32
  }
}

</mosaic_0001>

<bundles_post_ra>
// kernel: tpu_custom_call.1
= control target key start
LH: loop header
LB: loop body
LE: loop exit
PB: predicated region body
PF: predicated region fallthrough
CT: control target
= control target key end

     0   :  { %6 = vsyncpa [#allocation3], 0  ;;  %s126_s0 = inlined_call_operand.hbm [shape: f32[4,512], index: 0, kind: input, shape index: {}]   ;;  %s127_s1 = inlined_call_operand.hbm [shape: f32[4,512], index: 1, kind: output, shape index: {}]  }
   0x1   :  { %7 = vsyncpa [#allocation4], 0  ;;  %s90_s6 = smov [#allocation2]   ;;  %s42_s10 = scalar_lea.hbm %s126_s0, 256 }
   0x2   :  { %s14_s7 = sshll.u32 %s90_s6, 4  ;;  %p43_p0 = scmp.ne.s32.totalorder %s126_s0, %s42_s10  ;;  %s15_s7 = int_to_ptr.vmem [resolvable:$true] %s14_s7 }
   0x3   :  { %p46_p1 = scmp.lt.u32.totalorder %s42_s10, %s126_s0 }
   0x5   :  { %p48_p2 = pnand %p46_p1, %p43_p0 }
   0x7   :  { %51 = shalt.err (!%p48_p2)
}
   0x8   :  { %s52_s15 = scalar_lea.vmem %s15_s7, 256  ;;  %p57_p4 = scmp.lt.s32.totalorder %s15_s7, %s15_s7 }
   0x9   :  { %p53_p3 = scmp.ne.s32.totalorder %s15_s7, %s52_s15  ;;  %p58_p5 = scmp.lt.s32.totalorder %s52_s15, %s52_s15 }
   0xb   :  { %p59_p6 = por %p58_p5, %p57_p4 }
   0xd   :  { %p60_p7 = pnand %p59_p6, %p53_p3 }
   0xf   :  { %63 = shalt.err (!%p60_p7)
}
  0x10   :  { %17 = dma.hbm_to_vmem [thread:$0]  %s126_s0, 256, %s15_s7, [#allocation3]  }
  0x11   :  { %86 = dma.done.wait [#allocation3], 256  }
  0x12   :  { %87 = vsyncadd [#allocation3], 4294967040  ;;  %s91_s18 = smov [#allocation5]   ;;  %v21_v0 = vld [vmem:[#allocation2] sm:$0xff]  ;;  %v22_v1 = vld [vmem:[#allocation2 + $0x8] sm:$0xff] }
  0x13   :  { %s31_s19 = sshll.u32 %s91_s18, 4  ;;  %23 = vst [vmem:[#allocation5] sm:$0xff] %v21_v0  ;;  %24 = vst [vmem:[#allocation5 + $0x8] sm:$0xff] %v22_v1  ;;  %s32_s19 = int_to_ptr.vmem [resolvable:$true] %s31_s19 }
  0x14   :  { %s64_s20 = scalar_lea.vmem %s32_s19, 256  ;;  %p69_p9 = scmp.lt.s32.totalorder %s32_s19, %s32_s19 }
  0x15   :  { %p65_p8 = scmp.ne.s32.totalorder %s32_s19, %s64_s20  ;;  %p70_p10 = scmp.lt.s32.totalorder %s64_s20, %s64_s20 }
  0x17   :  { %p71_p11 = por %p70_p10, %p69_p9 }
  0x19   :  { %p72_p12 = pnand %p71_p11, %p65_p8 }
  0x1b   :  { %75 = shalt.err (!%p72_p12)
}
  0x1c   :  { %s76_s0 = scalar_lea.hbm %s127_s1, 256 }
  0x1d   :  { %p77_p13 = scmp.ne.s32.totalorder %s127_s1, %s76_s0  ;;  %p80_p0 = scmp.lt.u32.totalorder %s76_s0, %s127_s1 }
  0x1f   :  { %p82_p1 = pnand %p80_p0, %p77_p13 }
  0x21   :  { %85 = shalt.err (!%p82_p1)
}
  0x22   :  { %34 = dma.vmem_to_hbm [thread:$0]  %s32_s19, 256, %s127_s1, [#allocation4]  }
  0x23   :  { %88 = dma.done.wait [#allocation4], 256  }
  0x24   :  { %89 = vsyncadd [#allocation4], 4294967040 }
  0x25   :  { %38 = vsyncpa [#allocation3], 1 }
  0x26   :  { %39 = vsyncpa [#allocation4], 1 }

</bundles_post_ra>
